<compile_context>
chip_gen: v6e
topology: v6e:2x2x1
jax: 0.10.0
libtpu: 0.0.40
codegen_flags: <defaults>
</compile_context>

<pallas_src>
import jax
import jax.numpy as jnp
from jax.experimental import pallas as pl
from jax.experimental.pallas import tpu as pltpu

LN_EPS = 1e-5   # torch.nn.LayerNorm default


# ----------------------------- kernel helpers ------------------------------

def _layernorm(v, gamma, beta):
    # v: (R, C) f32, gamma/beta: (1, C) f32
    mean = jnp.mean(v, axis=-1, keepdims=True)
    var = jnp.mean(jnp.square(v - mean), axis=-1, keepdims=True)
    return (v - mean) * jax.lax.rsqrt(var + LN_EPS) * gamma + beta


def _elu(v):
    # ELU(alpha=1): x if x > 0 else exp(x) - 1   (f32)
    return jnp.where(v > 0, v, jnp.exp(jnp.minimum(v, 0.0)) - 1.0)


def _dot_bf16(a_f32, w_bf16):
    # bf16 operands, f32 accumulation (MXU-native on v6e/v7x, cheap on v5e).
    return jax.lax.dot_general(
        a_f32.astype(jnp.bfloat16), w_bf16,
        (((1,), (0,)), ((), ())),
        preferred_element_type=jnp.float32)


# --------------------------------- kernel ----------------------------------

def wf_linear_adapter_kernel(x_ref,                       # (TM, Din) f32
                             w_in_ref, b_in_ref,          # (Din, E) bf16, (1, E) f32
                             w_out_ref, b_out_ref,        # (E, Din) bf16, (1, Din) f32
                             g_in_ref, beta_in_ref,       # (1, E) f32
                             g_out_ref, beta_out_ref,     # (1, Din) f32
                             o_ref):                      # (TM, Din) f32
    x = x_ref[...]                                        # (TM, Din) f32

    # ---- WFLinear in (weights pre-fused wrapper-side) -> ONE MXU push ------
    h = _dot_bf16(x, w_in_ref[...]) + b_in_ref[...]       # (TM, E) f32 acc

    # ---- out = norm_inside( ELU(h) ) ---------------------------------------
    h = _layernorm(_elu(h), g_in_ref[...], beta_in_ref[...])

    # ---- WFLinear out -> ONE MXU push ---------------------------------------
    y = _dot_bf16(h, w_out_ref[...]) + b_out_ref[...]     # (TM, Din) f32 acc

    # ---- out = norm_outside( ELU(x + y) ) ----------------------------------
    o_ref[...] = _layernorm(_elu(x + y), g_out_ref[...], beta_out_ref[...])


# -------------------------------- wrapper -----------------------------------

def _round_up(n, m):
    return ((n + m - 1) // m) * m


def _vmem_bytes(tm, din, e):
    """Working-set estimate incl. double-buffered streams and temporaries."""
    f32, bf16 = 4, 2
    streams = 2 * (2 * tm * din * f32)                 # x in + out: 2 bufs each
    temps = (tm * e * f32                              # h (f32 accumulator)
             + tm * din * bf16 + tm * e * bf16         # bf16 copies at dot inputs
             + 2 * tm * din * f32                      # x+y / LN temporaries
             + tm * e * f32)                           # inner-LN temporary
    weights = 2 * (din * e) * bf16 + 3 * (din + e) * f32   # fused W + biases + LN
    return streams + temps + weights


def wf_linear_adapter(x, language_id, params, *, tm_max=512):
    B, T, Din = x.shape
    E = params["w_in_share"].shape[1]
    L = params["w_in_lang"].shape[0]
    BT = B * T

    # Fail loudly on mismatched configs.
    assert params["w_in_share"].shape == (Din, E)
    assert params["w_in_lang"].shape == (L, Din, E)
    assert params["b_in_share"].shape == (1, E)
    assert params["b_in_lang"].shape == (L, 1, E)
    assert params["w_out_share"].shape == (E, Din)
    assert params["w_out_lang"].shape == (L, E, Din)
    assert params["b_out_share"].shape == (1, Din)
    assert params["b_out_lang"].shape == (L, 1, Din)
    assert params["norm_in_gamma"].shape == (1, E)
    assert params["norm_in_beta"].shape == (1, E)
    assert params["norm_out_gamma"].shape == (1, Din)
    assert params["norm_out_beta"].shape == (1, Din)
    assert language_id.shape == (1,) and language_id.dtype == jnp.int32

    # ---- one-time weight fusion (shared + selected language), bf16 cast ----
    lid = language_id[0]
    w_in = (params["w_in_share"] + params["w_in_lang"][lid]).astype(jnp.bfloat16)
    b_in = (params["b_in_share"] + params["b_in_lang"][lid]).astype(jnp.float32)
    w_out = (params["w_out_share"] + params["w_out_lang"][lid]).astype(jnp.bfloat16)
    b_out = (params["b_out_share"] + params["b_out_lang"][lid]).astype(jnp.float32)

    # ---- row-tile selection (multiple of 8, fits a 12 MiB VMEM budget) -----
    vmem_budget = 12 * 1024 * 1024      # safe under v5e's 16 MiB scoped default
    TM = min(tm_max, _round_up(BT, 8))
    while TM > 8 and _vmem_bytes(TM, Din, E) > vmem_budget:
        TM = max(8, _round_up(TM // 2, 8))
    est = _vmem_bytes(TM, Din, E)
    assert est <= vmem_budget, (
        f"working set ~{est} B with TM={TM}; re-derive tiling for this config")

    BT_pad = _round_up(BT, TM)
    n_tiles = BT_pad // TM

    # Every op is row-wise over the last dim -> flattening (B, T) is exact;
    # zero-padded rows are computed (finite through LN eps) and sliced off.
    x2 = x.reshape(BT, Din).astype(jnp.float32)
    if BT_pad != BT:
        x2 = jnp.pad(x2, ((0, BT_pad - BT), (0, 0)))

    def const(shape):
        n = len(shape)
        return pl.BlockSpec(shape, lambda i, _n=n: (0,) * _n)

    grid_spec = pltpu.PrefetchScalarGridSpec(
        num_scalar_prefetch=0,
        grid=(n_tiles,),
        in_specs=[
            pl.BlockSpec((TM, Din), lambda i: (i, 0)),   # x (row-tiled, pipelined)
            const((Din, E)),                             # fused W_in (bf16)
            const((1, E)),                               # fused b_in
            const((E, Din)),                             # fused W_out (bf16)
            const((1, Din)),                             # fused b_out
            const((1, E)),                               # norm_inside gamma
            const((1, E)),                               # norm_inside beta
            const((1, Din)),                             # norm_outside gamma
            const((1, Din)),                             # norm_outside beta
        ],
        out_specs=pl.BlockSpec((TM, Din), lambda i: (i, 0)),
    )

    vmem_limit = int(min(32 * 1024 * 1024, max(16 * 1024 * 1024, 2 * est)))

    out = pl.pallas_call(
        wf_linear_adapter_kernel,
        grid_spec=grid_spec,
        out_shape=jax.ShapeDtypeStruct((BT_pad, Din), jnp.float32),
        compiler_params=pltpu.CompilerParams(
            dimension_semantics=("parallel",),           # megacore-shardable on v7x
            vmem_limit_bytes=vmem_limit),
    )(x2, w_in, b_in, w_out, b_out,
      params["norm_in_gamma"], params["norm_in_beta"],
      params["norm_out_gamma"], params["norm_out_beta"])

    return out[:BT].reshape(B, T, Din)


# ------------------------------ pure-JAX ref ---------------------------------

def reference(x, language_id, p):
    lid = language_id[0]

    def ln(v, g, b):
        m = jnp.mean(v, -1, keepdims=True)
        var = jnp.mean(jnp.square(v - m), -1, keepdims=True)
        return (v - m) * jax.lax.rsqrt(var + LN_EPS) * g + b

    def elu(v):
        return jnp.where(v > 0, v, jnp.exp(jnp.minimum(v, 0.0)) - 1.0)

    w_in = p["w_in_share"] + p["w_in_lang"][lid]
    b_in = p["b_in_share"][0] + p["b_in_lang"][lid, 0]
    h = x @ w_in + b_in
    h = ln(elu(h), p["norm_in_gamma"][0], p["norm_in_beta"][0])

    w_out = p["w_out_share"] + p["w_out_lang"][lid]
    b_out = p["b_out_share"][0] + p["b_out_lang"][lid, 0]
    y = h @ w_out + b_out
    return ln(elu(x + y), p["norm_out_gamma"][0], p["norm_out_beta"][0])


# --------------------------------- main --------------------------------------

if __name__ == "__main__":
    # in_dim=128 keeps loads/stores lane-dense; embed_dim=64 exercises
    # in_dim != embed_dim (the module does not require them equal).
    B, T, Din, E, L = 2, 8, 128, 64, 3

    key = jax.random.PRNGKey(0)
    ks = jax.random.split(key, 20)

    def rnd(k, shape, s=0.1):
        return jax.random.normal(k, shape, jnp.float32) * s

    params = {
        "w_in_share": rnd(ks[0], (Din, E)),
        "w_in_lang": rnd(ks[1], (L, Din, E)),
        "b_in_share": rnd(ks[2], (1, E), 0.05),
        "b_in_lang": rnd(ks[3], (L, 1, E), 0.05),
        "w_out_share": rnd(ks[4], (E, Din)),
        "w_out_lang": rnd(ks[5], (L, E, Din)),
        "b_out_share": rnd(ks[6], (1, Din), 0.05),
        "b_out_lang": rnd(ks[7], (L, 1, Din), 0.05),
        "norm_in_gamma": 1.0 + rnd(ks[8], (1, E), 0.05),
        "norm_in_beta": rnd(ks[9], (1, E), 0.05),
        "norm_out_gamma": 1.0 + rnd(ks[10], (1, Din), 0.05),
        "norm_out_beta": rnd(ks[11], (1, Din), 0.05),
    }
    x = jax.random.normal(ks[12], (B, T, Din), jnp.float32)
    language_id = jnp.array([1], dtype=jnp.int32)

    out = jax.block_until_ready(wf_linear_adapter(x, language_id, params))
    ref = jax.block_until_ready(reference(x, language_id, params))

    assert out.shape == (B, T, Din)
    assert bool(jnp.all(jnp.isfinite(out)))
    max_err = float(jnp.max(jnp.abs(out - ref)))
    # bf16 matmul operands vs f32 reference: expected max abs err ~1e-2.
    assert max_err < 5e-2, f"kernel/reference mismatch, max abs err = {max_err}"
    print("KERNEL_OK")
</pallas_src>

<mosaic_0001>
module attributes {stable_mosaic.version = 11 : i64} {
  func.func @wf_linear_adapter_kernel(%arg0: i32, %arg1: memref<16x128xf32, #tpu.memory_space<vmem>>, %arg2: memref<128x64xbf16, #tpu.memory_space<vmem>>, %arg3: memref<1x64xf32, #tpu.memory_space<vmem>>, %arg4: memref<64x128xbf16, #tpu.memory_space<vmem>>, %arg5: memref<1x128xf32, #tpu.memory_space<vmem>>, %arg6: memref<1x64xf32, #tpu.memory_space<vmem>>, %arg7: memref<1x64xf32, #tpu.memory_space<vmem>>, %arg8: memref<1x128xf32, #tpu.memory_space<vmem>>, %arg9: memref<1x128xf32, #tpu.memory_space<vmem>>, %arg10: memref<16x128xf32, #tpu.memory_space<vmem>>) attributes {dimension_semantics = [#tpu.dimension_semantics<parallel>], iteration_bounds = array<i64: 1>, scalar_prefetch = 0 : i64, scratch_operands = 0 : i64, tpu.core_type = #tpu.core_type<tc>, window_params = [{transform_indices = @transform_0, window_bounds = array<i64: 16, 128>}, {pipeline_mode = #tpu.pipeline_mode<synchronous>, transform_indices = @transform_1, window_bounds = array<i64: 128, 64>}, {pipeline_mode = #tpu.pipeline_mode<synchronous>, transform_indices = @transform_2, window_bounds = array<i64: 1, 64>}, {pipeline_mode = #tpu.pipeline_mode<synchronous>, transform_indices = @transform_3, window_bounds = array<i64: 64, 128>}, {pipeline_mode = #tpu.pipeline_mode<synchronous>, transform_indices = @transform_4, window_bounds = array<i64: 1, 128>}, {pipeline_mode = #tpu.pipeline_mode<synchronous>, transform_indices = @transform_5, window_bounds = array<i64: 1, 64>}, {pipeline_mode = #tpu.pipeline_mode<synchronous>, transform_indices = @transform_6, window_bounds = array<i64: 1, 64>}, {pipeline_mode = #tpu.pipeline_mode<synchronous>, transform_indices = @transform_7, window_bounds = array<i64: 1, 128>}, {pipeline_mode = #tpu.pipeline_mode<synchronous>, transform_indices = @transform_8, window_bounds = array<i64: 1, 128>}, {transform_indices = @transform_9, window_bounds = array<i64: 16, 128>}]} {
    %c0 = arith.constant 0 : index
    %c0_0 = arith.constant 0 : index
    %0 = vector.load %arg1[%c0, %c0_0] : memref<16x128xf32, #tpu.memory_space<vmem>>, vector<16x128xf32>
    %c0_1 = arith.constant 0 : index
    %c0_2 = arith.constant 0 : index
    %1 = vector.load %arg2[%c0_1, %c0_2] : memref<128x64xbf16, #tpu.memory_space<vmem>>, vector<128x64xbf16>
    %2 = arith.truncf %0 : vector<16x128xf32> to vector<16x128xbf16>
    %cst = arith.constant dense<0.000000e+00> : vector<16x64xf32>
    %3 = tpu.matmul %2, %1, %cst {dimension_numbers = #tpu.dot_dimension_numbers<[1], [0], [0], [1], [0, 0, 1, 1], [], []>} : vector<16x128xbf16>, vector<128x64xbf16>, vector<16x64xf32> -> vector<16x64xf32>
    %c0_3 = arith.constant 0 : index
    %c0_4 = arith.constant 0 : index
    %4 = vector.load %arg3[%c0_3, %c0_4] : memref<1x64xf32, #tpu.memory_space<vmem>>, vector<1x64xf32>
    %5 = vector.broadcast %4 : vector<1x64xf32> to vector<16x64xf32>
    %6 = arith.addf %3, %5 : vector<16x64xf32>
    %cst_5 = arith.constant 0.000000e+00 : f32
    %7 = vector.broadcast %cst_5 : f32 to vector<16x64xf32>
    %8 = arith.cmpf ogt, %6, %7 : vector<16x64xf32>
    %cst_6 = arith.constant 0.000000e+00 : f32
    %9 = vector.broadcast %cst_6 : f32 to vector<16x64xf32>
    %10 = arith.minimumf %6, %9 : vector<16x64xf32>
    %11 = math.exp %10 : vector<16x64xf32>
    %cst_7 = arith.constant 1.000000e+00 : f32
    %12 = vector.broadcast %cst_7 : f32 to vector<16x64xf32>
    %13 = arith.subf %11, %12 : vector<16x64xf32>
    %14 = arith.select %8, %6, %13 : vector<16x64xi1>, vector<16x64xf32>
    %c0_8 = arith.constant 0 : index
    %c0_9 = arith.constant 0 : index
    %15 = vector.load %arg6[%c0_8, %c0_9] : memref<1x64xf32, #tpu.memory_space<vmem>>, vector<1x64xf32>
    %c0_10 = arith.constant 0 : index
    %c0_11 = arith.constant 0 : index
    %16 = vector.load %arg7[%c0_10, %c0_11] : memref<1x64xf32, #tpu.memory_space<vmem>>, vector<1x64xf32>
    %cst_12 = arith.constant dense<0.000000e+00> : vector<16xf32>
    %17 = vector.multi_reduction <add>, %14, %cst_12 [1] : vector<16x64xf32> to vector<16xf32>
    %18 = vector.shape_cast %17 : vector<16xf32> to vector<16x1xf32>
    %cst_13 = arith.constant 6.400000e+01 : f32
    %19 = vector.broadcast %cst_13 : f32 to vector<16x1xf32>
    %20 = arith.divf %18, %19 : vector<16x1xf32>
    %21 = vector.broadcast %20 : vector<16x1xf32> to vector<16x64xf32>
    %22 = arith.subf %14, %21 : vector<16x64xf32>
    %23 = arith.mulf %22, %22 : vector<16x64xf32>
    %cst_14 = arith.constant dense<0.000000e+00> : vector<16xf32>
    %24 = vector.multi_reduction <add>, %23, %cst_14 [1] : vector<16x64xf32> to vector<16xf32>
    %25 = vector.shape_cast %24 : vector<16xf32> to vector<16x1xf32>
    %cst_15 = arith.constant 6.400000e+01 : f32
    %26 = vector.broadcast %cst_15 : f32 to vector<16x1xf32>
    %27 = arith.divf %25, %26 : vector<16x1xf32>
    %28 = vector.broadcast %20 : vector<16x1xf32> to vector<16x64xf32>
    %29 = arith.subf %14, %28 : vector<16x64xf32>
    %cst_16 = arith.constant 9.99999974E-6 : f32
    %30 = vector.broadcast %cst_16 : f32 to vector<16x1xf32>
    %31 = arith.addf %27, %30 : vector<16x1xf32>
    %32 = math.rsqrt %31 : vector<16x1xf32>
    %33 = vector.broadcast %32 : vector<16x1xf32> to vector<16x64xf32>
    %34 = arith.mulf %29, %33 : vector<16x64xf32>
    %35 = vector.broadcast %15 : vector<1x64xf32> to vector<16x64xf32>
    %36 = arith.mulf %34, %35 : vector<16x64xf32>
    %37 = vector.broadcast %16 : vector<1x64xf32> to vector<16x64xf32>
    %38 = arith.addf %36, %37 : vector<16x64xf32>
    %c0_17 = arith.constant 0 : index
    %c0_18 = arith.constant 0 : index
    %39 = vector.load %arg4[%c0_17, %c0_18] : memref<64x128xbf16, #tpu.memory_space<vmem>>, vector<64x128xbf16>
    %40 = arith.truncf %38 : vector<16x64xf32> to vector<16x64xbf16>
    %cst_19 = arith.constant dense<0.000000e+00> : vector<16x128xf32>
    %41 = tpu.matmul %40, %39, %cst_19 {dimension_numbers = #tpu.dot_dimension_numbers<[1], [0], [0], [1], [0, 0, 1, 1], [], []>} : vector<16x64xbf16>, vector<64x128xbf16>, vector<16x128xf32> -> vector<16x128xf32>
    %c0_20 = arith.constant 0 : index
    %c0_21 = arith.constant 0 : index
    %42 = vector.load %arg5[%c0_20, %c0_21] : memref<1x128xf32, #tpu.memory_space<vmem>>, vector<1x128xf32>
    %43 = vector.broadcast %42 : vector<1x128xf32> to vector<16x128xf32>
    %44 = arith.addf %41, %43 : vector<16x128xf32>
    %45 = arith.addf %0, %44 : vector<16x128xf32>
    %cst_22 = arith.constant 0.000000e+00 : f32
    %46 = vector.broadcast %cst_22 : f32 to vector<16x128xf32>
    %47 = arith.cmpf ogt, %45, %46 : vector<16x128xf32>
    %cst_23 = arith.constant 0.000000e+00 : f32
    %48 = vector.broadcast %cst_23 : f32 to vector<16x128xf32>
    %49 = arith.minimumf %45, %48 : vector<16x128xf32>
    %50 = math.exp %49 : vector<16x128xf32>
    %cst_24 = arith.constant 1.000000e+00 : f32
    %51 = vector.broadcast %cst_24 : f32 to vector<16x128xf32>
    %52 = arith.subf %50, %51 : vector<16x128xf32>
    %53 = arith.select %47, %45, %52 : vector<16x128xi1>, vector<16x128xf32>
    %c0_25 = arith.constant 0 : index
    %c0_26 = arith.constant 0 : index
    %54 = vector.load %arg8[%c0_25, %c0_26] : memref<1x128xf32, #tpu.memory_space<vmem>>, vector<1x128xf32>
    %c0_27 = arith.constant 0 : index
    %c0_28 = arith.constant 0 : index
    %55 = vector.load %arg9[%c0_27, %c0_28] : memref<1x128xf32, #tpu.memory_space<vmem>>, vector<1x128xf32>
    %cst_29 = arith.constant dense<0.000000e+00> : vector<16xf32>
    %56 = vector.multi_reduction <add>, %53, %cst_29 [1] : vector<16x128xf32> to vector<16xf32>
    %57 = vector.shape_cast %56 : vector<16xf32> to vector<16x1xf32>
    %cst_30 = arith.constant 1.280000e+02 : f32
    %58 = vector.broadcast %cst_30 : f32 to vector<16x1xf32>
    %59 = arith.divf %57, %58 : vector<16x1xf32>
    %60 = vector.broadcast %59 : vector<16x1xf32> to vector<16x128xf32>
    %61 = arith.subf %53, %60 : vector<16x128xf32>
    %62 = arith.mulf %61, %61 : vector<16x128xf32>
    %cst_31 = arith.constant dense<0.000000e+00> : vector<16xf32>
    %63 = vector.multi_reduction <add>, %62, %cst_31 [1] : vector<16x128xf32> to vector<16xf32>
    %64 = vector.shape_cast %63 : vector<16xf32> to vector<16x1xf32>
    %cst_32 = arith.constant 1.280000e+02 : f32
    %65 = vector.broadcast %cst_32 : f32 to vector<16x1xf32>
    %66 = arith.divf %64, %65 : vector<16x1xf32>
    %67 = vector.broadcast %59 : vector<16x1xf32> to vector<16x128xf32>
    %68 = arith.subf %53, %67 : vector<16x128xf32>
    %cst_33 = arith.constant 9.99999974E-6 : f32
    %69 = vector.broadcast %cst_33 : f32 to vector<16x1xf32>
    %70 = arith.addf %66, %69 : vector<16x1xf32>
    %71 = math.rsqrt %70 : vector<16x1xf32>
    %72 = vector.broadcast %71 : vector<16x1xf32> to vector<16x128xf32>
    %73 = arith.mulf %68, %72 : vector<16x128xf32>
    %74 = vector.broadcast %54 : vector<1x128xf32> to vector<16x128xf32>
    %75 = arith.mulf %73, %74 : vector<16x128xf32>
    %76 = vector.broadcast %55 : vector<1x128xf32> to vector<16x128xf32>
    %77 = arith.addf %75, %76 : vector<16x128xf32>
    %c0_34 = arith.constant 0 : index
    %c0_35 = arith.constant 0 : index
    %78 = vector.load %arg10[%c0_34, %c0_35] : memref<16x128xf32, #tpu.memory_space<vmem>>, vector<16x128xf32>
    tpu.vector_store %arg10[%c0_34, %c0_35], %77 {strides = array<i32>} : memref<16x128xf32, #tpu.memory_space<vmem>>, vector<16x128xf32>,
    return
  }
  func.func @transform_0(%arg0: i32) -> (i32, i32) {
    %c0_i32 = arith.constant 0 : i32
    %c0_i32_0 = arith.constant 0 : i32
    return %arg0, %c0_i32 : i32, i32
  }
  func.func @transform_1(%arg0: i32) -> (i32, i32) {
    %c0_i32 = arith.constant 0 : i32
    %c0_i32_0 = arith.constant 0 : i32
    %c0_i32_1 = arith.constant 0 : i32
    return %c0_i32, %c0_i32_0 : i32, i32
  }
  func.func @transform_2(%arg0: i32) -> (i32, i32) {
    %c0_i32 = arith.constant 0 : i32
    %c0_i32_0 = arith.constant 0 : i32
    %c0_i32_1 = arith.constant 0 : i32
    return %c0_i32, %c0_i32_0 : i32, i32
  }
  func.func @transform_3(%arg0: i32) -> (i32, i32) {
    %c0_i32 = arith.constant 0 : i32
    %c0_i32_0 = arith.constant 0 : i32
    %c0_i32_1 = arith.constant 0 : i32
    return %c0_i32, %c0_i32_0 : i32, i32
  }
  func.func @transform_4(%arg0: i32) -> (i32, i32) {
    %c0_i32 = arith.constant 0 : i32
    %c0_i32_0 = arith.constant 0 : i32
    %c0_i32_1 = arith.constant 0 : i32
    return %c0_i32, %c0_i32_0 : i32, i32
  }
  func.func @transform_5(%arg0: i32) -> (i32, i32) {
    %c0_i32 = arith.constant 0 : i32
    %c0_i32_0 = arith.constant 0 : i32
    %c0_i32_1 = arith.constant 0 : i32
    return %c0_i32, %c0_i32_0 : i32, i32
  }
  func.func @transform_6(%arg0: i32) -> (i32, i32) {
    %c0_i32 = arith.constant 0 : i32
    %c0_i32_0 = arith.constant 0 : i32
    %c0_i32_1 = arith.constant 0 : i32
    return %c0_i32, %c0_i32_0 : i32, i32
  }
  func.func @transform_7(%arg0: i32) -> (i32, i32) {
    %c0_i32 = arith.constant 0 : i32
    %c0_i32_0 = arith.constant 0 : i32
    %c0_i32_1 = arith.constant 0 : i32
    return %c0_i32, %c0_i32_0 : i32, i32
  }
  func.func @transform_8(%arg0: i32) -> (i32, i32) {
    %c0_i32 = arith.constant 0 : i32
    %c0_i32_0 = arith.constant 0 : i32
    %c0_i32_1 = arith.constant 0 : i32
    return %c0_i32, %c0_i32_0 : i32, i32
  }
  func.func @transform_9(%arg0: i32) -> (i32, i32) {
    %c0_i32 = arith.constant 0 : i32
    %c0_i32_0 = arith.constant 0 : i32
    return %arg0, %c0_i32 : i32, i32
  }
}

</mosaic_0001>

<bundles_post_ra>
// kernel: tpu_custom_call.1
= control target key start
LH: loop header
LB: loop body
LE: loop exit
PB: predicated region body
PF: predicated region fallthrough
CT: control target
= control target key end

     0   :  { %v488_v1 = vmov 0.0   ;;  %vm489_vm0 = vmmov 0   ;;  %s633_s0 = inlined_call_operand.vmem [shape: f32[16,128], index: 0, kind: input, shape index: {}]   ;;  %s634_s1 = inlined_call_operand.vmem [shape: bf16[128,64], index: 1, kind: input, shape index: {}]   ;;  %s635_s2 = inlined_call_operand.vmem [shape: f32[1,64], index: 2, kind: input, shape index: {}]   ;;  %s636_s3 = inlined_call_operand.vmem [shape: bf16[64,128], index: 3, kind: input, shape index: {}]   ;;  %s637_s4 = inlined_call_operand.vmem [shape: f32[1,128], index: 4, kind: input, shape index: {}]   ;;  %s638_s5 = inlined_call_operand.vmem [shape: f32[1,64], index: 5, kind: input, shape index: {}]   ;;  %s639_s6 = inlined_call_operand.vmem [shape: f32[1,64], index: 6, kind: input, shape index: {}]   ;;  %s640_s7 = inlined_call_operand.vmem [shape: f32[1,128], index: 7, kind: input, shape index: {}]   ;;  %s641_s8 = inlined_call_operand.vmem [shape: f32[1,128], index: 8, kind: input, shape index: {}]   ;;  %s642_s9 = inlined_call_operand.hbm [shape: f32[16,128], index: 9, kind: output, shape index: {}]  }
   0x1   :  { %v438_v0 = vld [vmem:[%s634_s1 + $0x38] sm:$0xff]   ;;  %401 = vmatprep.subr.bf16.mxu0 %v488_v1  ;;  %421 = vmatprep.subr.bf16.mxu1 %v488_v1  ;;  %v439_v2 = vld [vmem:[%s634_s1 + $0x30] sm:$0xff]   ;;  %v440_v3 = vld [vmem:[%s634_s1 + $0x28] sm:$0xff]  }
   0x2   :  { %402 = vmatpush3.bf16.msra.mxu0 %v438_v0  ;;  %417 = vmatprep.mubr.msk.bf16.mxu0 %vm489_vm0, %v488_v1  ;;  %v441_v4 = vld [vmem:[%s634_s1 + $0x20] sm:$0xff]  }
   0x3   :  { %403 = vmatprep.subr.bf16.mxu0 %v488_v1  ;;  %429 = vmatprep.mubr.msk.bf16.mxu1 %vm489_vm0, %v488_v1 }
   0x6   :  { %404 = vmatpush3.bf16.msra.mxu0 %v439_v2 }
   0x7   :  { %405 = vmatprep.subr.bf16.mxu0 %v488_v1 }
   0xa   :  { %406 = vmatpush3.bf16.msra.mxu0 %v440_v3 }
   0xb   :  { %407 = vmatprep.subr.bf16.mxu0 %v488_v1 }
   0xc   :  { %14 = vsyncpa [#allocation3], 0  ;;  %v442_v5 = vld [vmem:[%s634_s1 + $0x18] sm:$0xff]   ;;  %v443_v6 = vld [vmem:[%s634_s1 + $0x10] sm:$0xff]   ;;  %vm163_vm1 = vcmask 523264   ;;  %s490_s21 = smov [#allocation2]  }
   0xd   :  { %v444_v7 = vld [vmem:[%s634_s1 + $0x8] sm:$0xff]   ;;  %v445_v8 = vld [vmem:[%s634_s1] sm:$0xff]   ;;  %v446_v41 = vld [vmem:[%s636_s3 + $0x18] sm:$0xff]   ;;  %s353_s22 = sshll.u32 %s490_s21, 4  ;;  %s354_s22 = int_to_ptr.vmem [resolvable:$true] %s353_s22 }
   0xe   :  { %408 = vmatpush3.bf16.msra.mxu0 %v441_v4  ;;  %v580_v9 = vld [vmem:[%s633_s0] sm:$0xff]  ;;  %v585_v10 = vld [vmem:[%s633_s0 + $0x8] sm:$0xff]  ;;  %422 = vmatpush3.bf16.msra.mxu1 %v446_v41  ;;  %v447_v42 = vld [vmem:[%s636_s3 + $0x10] sm:$0xff]   ;;  %s466_s23 = scalar_lea.vmem %s354_s22, 256  ;;  %p471_p1 = scmp.lt.s32.totalorder %s354_s22, %s354_s22 }
   0xf   :  { %409 = vmatprep.subr.bf16.mxu0 %v488_v1  ;;  %v52_v11 = vpack.c.bf16 %v585_v10, %v580_v9  ;;  %v364_v12 = vld [vmem:[%s635_s2] ss:$0 sm:$0xff]  ;;  %423 = vmatprep.subr.bf16.mxu1 %v488_v1  ;;  %v448_v43 = vld [vmem:[%s636_s3 + $0x8] sm:$0xff]   ;;  %p467_p0 = scmp.ne.s32.totalorder %s354_s22, %s466_s23  ;;  %p472_p2 = scmp.lt.s32.totalorder %s466_s23, %s466_s23 }
  0x10   :  { %v449_v44 = vld [vmem:[%s636_s3] sm:$0xff]  }
  0x11   :  { %v375_v53 = vld [vmem:[%s638_s5] ss:$0 sm:$0xff]  ;;  %p473_p3 = por %p472_p2, %p471_p1 }
  0x12   :  { %410 = vmatpush3.bf16.msra.mxu0 %v442_v5  ;;  %424 = vmatpush3.bf16.msra.mxu1 %v447_v42  ;;  %v376_v57 = vld [vmem:[%s639_s6] ss:$0 sm:$0xff] }
  0x13   :  { %411 = vmatprep.subr.bf16.mxu0 %v488_v1  ;;  %425 = vmatprep.subr.bf16.mxu1 %v488_v1  ;;  %v377_v62 = vld [vmem:[%s637_s4] ss:$0 sm:$0xff]  ;;  %p474_p4 = pnand %p473_p3, %p467_p0 }
  0x16   :  { %412 = vmatpush3.bf16.msra.mxu0 %v443_v6  ;;  %426 = vmatpush3.bf16.msra.mxu1 %v448_v43 }
  0x17   :  { %413 = vmatprep.subr.bf16.mxu0 %v488_v1  ;;  %427 = vmatprep.subr.bf16.mxu1 %v488_v1 }
  0x1a   :  { %414 = vmatpush3.bf16.msra.mxu0 %v444_v7  ;;  %428 = vmatpush3.bf16.msra.mxu1 %v449_v44 }
  0x1b   :  { %415 = vmatprep.subr.bf16.mxu0 %v488_v1 }
  0x1e   :  { %416 = vmatpush3.bf16.msra.mxu0 %v445_v8 }
  0x21   :  { %418 = vmatmul.mubr.bf16.vlgmr.msra.gmra.mxu0 %v52_v11 }
  0xe1   :  { %v142_v13 = vpop.f32.mrf.mxu0 }
  0xe2   :  { %v143_v14 = vadd.f32 %v364_v12, %v142_v13 }
  0xe3   :  { %v419_v15 = vpop.f32.mrf.mxu0 }
  0xe4   :  { %v151_v16 = vmin.f32 %v143_v14, 0.0  ;;  %vm149_vm2 = vcmp.gt.f32.partialorder %v143_v14, 0.0 }
  0xe5   :  { %v145_v17 = vpop.f32.mrf.mxu0 }
  0xe6   :  { %v153_v18 = vmul.f32 1.442695, %v151_v16  ;;  %v146_v19 = vadd.f32 %v364_v12, %v145_v17 }
  0xe7   :  { %v420_v20 = vpop.f32.mrf.mxu0 }
  0xe8   :  { %450 = vpow2.f32 %v153_v18  ;;  %v152_v21 = vmin.f32 %v146_v19, 0.0  ;;  %vm150_vm3 = vcmp.gt.f32.partialorder %v146_v19, 0.0 }
  0xea   :  { %v155_v22 = vmul.f32 1.442695, %v152_v21 }
  0xec   :  { %452 = vpow2.f32 %v155_v22 }
  0xf5   :  { %v451_v23 = vpop.eup %450 }
  0xf6   :  { %v373_v24 = vadd.f32 -1.0, %v451_v23 }
  0xf8   :  { %v159_v25 = vsel %vm149_vm2, %v143_v14, %v373_v24 }
  0xf9   :  { %v453_v26 = vpop.eup %452  ;;  %v164_v27 = vsel %vm163_vm1, %v159_v25, 0.0 }
  0xfa   :  { %165 = vadd.xlane.f32.xlu0 %v164_v27  ;;  %v374_v28 = vadd.f32 -1.0, %v453_v26 }
  0xfc   :  { %v160_v29 = vsel %vm150_vm3, %v146_v19, %v374_v28 }
  0xfd   :  { %v167_v30 = vsel %vm163_vm1, %v160_v29, 0.0 }
  0xfe   :  { %168 = vadd.xlane.f32.xlu0 %v167_v30 }
 0x183   :  { %v166_v31 = vpop.xlane.xlu0 %165 }
 0x184   :  { %v171_v32 = vmul.f32 0.015625, %v166_v31 }
 0x186   :  { %v173_v33 = vsub.f32 %v159_v25, %v171_v32  ;;  %v385_v32 = vld [vmem:[%s640_s7] ss:$0 sm:$0xff] }
 0x187   :  { %v169_v34 = vpop.xlane.xlu0 %168 }
 0x188   :  { %v172_v35 = vmul.f32 0.015625, %v169_v34  ;;  %v175_v36 = vmul.f32 %v173_v33, %v173_v33  ;;  %v386_v34 = vld [vmem:[%s641_s8] ss:$0 sm:$0xff] }
 0x18a   :  { %v174_v37 = vsub.f32 %v160_v29, %v172_v35  ;;  %v177_v38 = vsel %vm163_vm1, %v175_v36, 0.0 }
 0x18b   :  { %178 = vadd.xlane.f32.xlu1 %v177_v38 }
 0x18c   :  { %v176_v39 = vmul.f32 %v174_v37, %v174_v37 }
 0x18e   :  { %v180_v40 = vsel %vm163_vm1, %v176_v39, 0.0 }
 0x18f   :  { %181 = vadd.xlane.f32.xlu1 %v180_v40 }
 0x214   :  { %v179_v45 = vpop.xlane.xlu1 %178 }
 0x215   :  { %v183_v46 = vmul.f32 0.015625, %v179_v45 }
 0x217   :  { %v185_v47 = vadd.f32 1e-05, %v183_v46 }
 0x218   :  { %v182_v48 = vpop.xlane.xlu1 %181 }
 0x219   :  { %454 = vrsqrt.f32 %v185_v47  ;;  %v184_v49 = vmul.f32 0.015625, %v182_v48 }
 0x21b   :  { %v186_v50 = vadd.f32 1e-05, %v184_v49 }
 0x21d   :  { %456 = vrsqrt.f32 %v186_v50 }
 0x226   :  { %v455_v51 = vpop.eup %454 }
 0x227   :  { %v189_v52 = vmul.f32 %v455_v51, %v173_v33 }
 0x229   :  { %v197_v56 = vmul.f32 %v375_v53, %v189_v52 }
 0x22a   :  { %v457_v54 = vpop.eup %456 }
 0x22b   :  { %v190_v55 = vmul.f32 %v457_v54, %v174_v37  ;;  %v205_v59 = vadd.f32 %v376_v57, %v197_v56 }
 0x22d   :  { %v198_v58 = vmul.f32 %v375_v53, %v190_v55 }
 0x22f   :  { %v206_v60 = vadd.f32 %v376_v57, %v198_v58 }
 0x231   :  { %v215_v61 = vpack.c.bf16 %v206_v60, %v205_v59 }
 0x233   :  { %430 = vmatmul.mubr.msk.bf16.vlgmr.msra.gmra.mxu1 %vm163_vm1, %v215_v61 }
 0x2f3   :  { %v284_v63 = vpop.f32.mrf.mxu1 }
 0x2f4   :  { %v285_v0 = vadd.f32 %v377_v62, %v284_v63 }
 0x2f5   :  { %v431_v1 = vpop.f32.mrf.mxu1 }
 0x2f6   :  { %v291_v2 = vadd.f32 %v285_v0, %v580_v9 }
 0x2f7   :  { %v287_v3 = vpop.f32.mrf.mxu1 }
 0x2f8   :  { %v295_v4 = vmin.f32 %v291_v2, 0.0  ;;  %v288_v5 = vadd.f32 %v377_v62, %v287_v3  ;;  %vm293_vm4 = vcmp.gt.f32.partialorder %v291_v2, 0.0 }
 0x2f9   :  { %v432_v6 = vpop.f32.mrf.mxu1 }
 0x2fa   :  { %v297_v7 = vmul.f32 1.442695, %v295_v4  ;;  %v292_v8 = vadd.f32 %v288_v5, %v585_v10 }
 0x2fc   :  { %458 = vpow2.f32 %v297_v7  ;;  %v296_v11 = vmin.f32 %v292_v8, 0.0  ;;  %vm294_vm5 = vcmp.gt.f32.partialorder %v292_v8, 0.0 }
 0x2fe   :  { %v299_v12 = vmul.f32 1.442695, %v296_v11 }
 0x300   :  { %460 = vpow2.f32 %v299_v12 }
 0x309   :  { %v459_v13 = vpop.eup %458 }
 0x30a   :  { %v383_v14 = vadd.f32 -1.0, %v459_v13 }
 0x30c   :  { %v303_v15 = vsel %vm293_vm4, %v291_v2, %v383_v14 }
 0x30d   :  { %v461_v16 = vpop.eup %460  ;;  %307 = vadd.xlane.f32.xlu0 %v303_v15 }
 0x30e   :  { %v384_v17 = vadd.f32 -1.0, %v461_v16 }
 0x310   :  { %v304_v9 = vsel %vm294_vm5, %v292_v8, %v384_v17 }
 0x311   :  { %309 = vadd.xlane.f32.xlu1 %v304_v9 }
 0x396   :  { %v308_v18 = vpop.xlane.xlu0 %307 }
 0x397   :  { %v312_v19 = vmul.f32 0.0078125, %v308_v18 }
 0x399   :  { %v314_v20 = vsub.f32 %v303_v15, %v312_v19 }
 0x39a   :  { %v310_v21 = vpop.xlane.xlu1 %309 }
 0x39b   :  { %v313_v22 = vmul.f32 0.0078125, %v310_v21  ;;  %v316_v10 = vmul.f32 %v314_v20, %v314_v20 }
 0x39d   :  { %v315_v23 = vsub.f32 %v304_v9, %v313_v22  ;;  %318 = vadd.xlane.f32.xlu0 %v316_v10 }
 0x39f   :  { %v317_v24 = vmul.f32 %v315_v23, %v315_v23 }
 0x3a1   :  { %320 = vadd.xlane.f32.xlu1 %v317_v24 }
 0x426   :  { %v319_v25 = vpop.xlane.xlu0 %318 }
 0x427   :  { %v322_v26 = vmul.f32 0.0078125, %v319_v25 }
 0x429   :  { %v324_v27 = vadd.f32 1e-05, %v322_v26 }
 0x42a   :  { %v321_v28 = vpop.xlane.xlu1 %320 }
 0x42b   :  { %462 = vrsqrt.f32 %v324_v27  ;;  %v323_v29 = vmul.f32 0.0078125, %v321_v28 }
 0x42d   :  { %v325_v30 = vadd.f32 1e-05, %v323_v29 }
 0x42f   :  { %464 = vrsqrt.f32 %v325_v30 }
 0x438   :  { %v463_v31 = vpop.eup %462 }
 0x439   :  { %v328_v33 = vmul.f32 %v463_v31, %v314_v20 }
 0x43b   :  { %v336_v35 = vmul.f32 %v385_v32, %v328_v33 }
 0x43c   :  { %v465_v36 = vpop.eup %464 }
 0x43d   :  { %v329_v37 = vmul.f32 %v465_v36, %v315_v23  ;;  %v344_v38 = vadd.f32 %v386_v34, %v336_v35 }
 0x43f   :  { %v337_v39 = vmul.f32 %v385_v32, %v329_v37  ;;  %346 = vst [vmem:[#allocation2] sm:$0xff] %v344_v38 }
 0x441   :  { %v345_v40 = vadd.f32 %v386_v34, %v337_v39 }
 0x443   :  { %347 = vst [vmem:[#allocation2 + $0x8] sm:$0xff] %v345_v40 }
 0x444   :  { %477 = shalt.err (!%p474_p4)
}
 0x445   :  { %s491_s7 = smov 128   ;;  %s492_s8 = smov 8  }
 0x446   :  { %359 = dma.vmem_to_hbm [thread:$0]  %s354_s22, 256, %s642_s9, [#allocation3], %s491_s7, %s491_s7, %s492_s8  }
 0x447   :  { %486 = dma.done.wait [#allocation3], 256  }
 0x448   :  { %487 = vsyncadd [#allocation3], 4294967040 }
 0x449   :  { %363 = vsyncpa [#allocation3], 1 }

</bundles_post_ra>
